<compile_context>
chip_gen: v5e
topology: v5e:2x2
jax: 0.10.0
libtpu: 0.0.40
codegen_flags: <defaults>
</compile_context>

<pallas_src>
import numpy as np
import jax
import jax.numpy as jnp
from jax.experimental import pallas as pl
from jax.experimental.pallas import tpu as pltpu


def build_idft_matrix(n, pack, complex_input):
    """f32 transform matrix for the real part of the ortho inverse DFT.

    complex_input=True : shape (2N, N), rows alternate cos / -sin (interleaved
                         re/im input layout).
    complex_input=False: shape (N, N), cosine matrix only.
    Replicated block-diagonally `pack` times (kron(I_pack, M)) for lane-packing.
    """
    k = np.arange(n, dtype=np.float64)[:, None]
    t = np.arange(n, dtype=np.float64)[None, :]
    ang = 2.0 * np.pi * k * t / n
    c = np.cos(ang) / np.sqrt(n)
    if complex_input:
        s = np.sin(ang) / np.sqrt(n)
        m = np.empty((2 * n, n), dtype=np.float64)
        m[0::2, :] = c
        m[1::2, :] = -s
    else:
        m = c
    if pack > 1:
        m = np.kron(np.eye(pack, dtype=np.float64), m)
    return jnp.asarray(m, jnp.float32)


def idft_matmul_kernel(x_ref, m_ref, o_ref):
    # One (tm, win) @ (win, wout) MXU matmul with f32 accumulation.
    # f32 operands take Mosaic's full-precision multi-pass MXU path (the same
    # path that already met the 1e-4 tolerance in the previous revision).
    o_ref[...] = jnp.dot(
        x_ref[...], m_ref[...], preferred_element_type=jnp.float32
    ).astype(o_ref.dtype)


def idft_real_last_dim(x_dft, tm_max=2048):
    """Real part of the ortho-normalized inverse DFT along the last axis."""
    orig_shape = x_dft.shape
    n = int(orig_shape[-1])
    is_complex = jnp.iscomplexobj(x_dft)

    if is_complex:
        x_re = jnp.real(x_dft)
        x_im = jnp.imag(x_dft)
        out_dtype = x_re.dtype
        # Interleave re/im along the last axis in one fused XLA pass:
        # row = [Xr0, Xi0, Xr1, Xi1, ...] of width 2N.
        xin = jnp.stack([x_re, x_im], axis=-1).reshape(-1, 2 * n)
        row_width = 2 * n
    else:
        # Real-input fast path: no zeros array, single cosine matrix.
        out_dtype = x_dft.dtype
        xin = x_dft.reshape(-1, n)
        row_width = n
    xin = xin.astype(jnp.float32)
    m_rows = xin.shape[0]

    # Lane-packing factor: put `pack` consecutive N-vectors side-by-side so the
    # output block is exactly 128 lanes wide (unmasked stores, 128-wide MXU
    # contraction). For general N not dividing 128, fall back to pack=1
    # (correct, but stores may be masked -- known perf cliff for odd N).
    if n < 128 and 128 % n == 0:
        pack = 128 // n
    else:
        pack = 1
    win = pack * row_width      # packed input row width
    wout = pack * n             # packed output row width

    # Pad rows only as needed for packing / a minimum of 8 packed sublanes
    # (at most 8*pack - 1 rows, NOT a full tile-multiple pad).
    m_pack = -(-m_rows // pack) * pack
    m_pack = max(m_pack, 8 * pack)
    if m_pack != m_rows:
        xin = jnp.pad(xin, ((0, m_pack - m_rows), (0, 0)))
    mp = m_pack // pack
    xin = xin.reshape(mp, win)

    mat = build_idft_matrix(n, pack, is_complex)

    # Row tile: as big as tm_max (amortize ~0.35us/step overhead; ~85%+ of the
    # HBM roofline at tm=2048), sublane-aligned for f32, but keep >= 2 grid
    # steps when possible so v7x's 2 TensorCores both stream.
    tm = max(8, (min(tm_max, mp) // 8) * 8)
    if mp > 8 and pl.cdiv(mp, tm) < 2:
        tm = max(8, (((mp + 1) // 2 + 7) // 8) * 8)
    grid = (pl.cdiv(mp, tm),)

    # Explicit VMEM budget (double-buffered in + out blocks + matrix), with
    # headroom; well under every generation's limit (incl. v5e's 16 MiB scoped
    # default and v7x's 64 MiB physical).
    block_bytes = 4 * (tm * win + tm * wout + win * wout)
    vmem_limit = int(min(max(2 * block_bytes + (2 << 20), 16 << 20), 64 << 20))

    # Useful FLOPs only (the kron block-diagonal structural zeros excluded).
    bytes_x = 4
    bytes_o = jnp.dtype(out_dtype).itemsize
    flops = (4 if is_complex else 2) * m_rows * n * n
    cost = pl.CostEstimate(
        flops=int(flops),
        transcendentals=0,
        bytes_accessed=int(mp * win * bytes_x + mp * wout * bytes_o
                           + win * wout * 4),
    )

    out = pl.pallas_call(
        idft_matmul_kernel,
        out_shape=jax.ShapeDtypeStruct((mp, wout), out_dtype),
        grid_spec=pltpu.PrefetchScalarGridSpec(
            num_scalar_prefetch=0,
            grid=grid,
            in_specs=[
                pl.BlockSpec((tm, win), lambda i: (i, 0)),     # packed rows
                pl.BlockSpec((win, wout), lambda i: (0, 0)),   # kron(I_P, M)
            ],
            out_specs=pl.BlockSpec((tm, wout), lambda i: (i, 0)),
        ),
        compiler_params=pltpu.CompilerParams(
            dimension_semantics=("parallel",),
            vmem_limit_bytes=vmem_limit,
        ),
        cost_estimate=cost,
    )(xin, mat)

    return out.reshape(m_pack, n)[:m_rows].reshape(orig_shape)


def idft_layer_forward(x_dft):
    """Pallas equivalent of IDFT_Layer.forward: ifft(X_dft, norm='ortho').real."""
    y = idft_real_last_dim(x_dft)
    # TODO(synk): reshape_tensor() is not defined in the provided spec; the real
    # part is returned with the input's shape unchanged.
    return y


def idft_reference(x_re, x_im):
    """Numpy reference: real part of ifft(X, norm='ortho') along last axis."""
    x = np.asarray(x_re, np.float64) + 1j * np.asarray(x_im, np.float64)
    return np.fft.ifft(x, axis=-1, norm="ortho").real.astype(np.float32)


if __name__ == "__main__":
    key = jax.random.PRNGKey(0)
    kr, ki = jax.random.split(key)
    shape = (2, 4, 16, 16)  # NCHW spectrum, IDFT along W
    x_re = jax.random.normal(kr, shape, dtype=jnp.float32)
    x_im = jax.random.normal(ki, shape, dtype=jnp.float32)

    # Complex path (matches the torch module's typical complex64 input).
    x_dft = jax.lax.complex(x_re, x_im)
    y = jax.block_until_ready(idft_layer_forward(x_dft))
    y_ref = idft_reference(np.asarray(x_re), np.asarray(x_im))
    np.testing.assert_allclose(np.asarray(y), y_ref, rtol=1e-4, atol=1e-4)

    # Real-input fast path (single cosine matmul, no zero imag stream).
    y_r = jax.block_until_ready(idft_layer_forward(x_re))
    y_r_ref = idft_reference(np.asarray(x_re), np.zeros_like(np.asarray(x_re)))
    np.testing.assert_allclose(np.asarray(y_r), y_r_ref, rtol=1e-4, atol=1e-4)

    print("KERNEL_OK")
</pallas_src>

<mosaic_0001>
module attributes {stable_mosaic.version = 11 : i64} {
  func.func @idft_matmul_kernel(%arg0: i32, %arg1: memref<8x256xf32, #tpu.memory_space<vmem>>, %arg2: memref<256x128xf32, #tpu.memory_space<vmem>>, %arg3: memref<8x128xf32, #tpu.memory_space<vmem>>) attributes {dimension_semantics = [#tpu.dimension_semantics<parallel>], iteration_bounds = array<i64: 2>, scalar_prefetch = 0 : i64, scratch_operands = 0 : i64, tpu.core_type = #tpu.core_type<tc>, window_params = [{transform_indices = @transform_0, window_bounds = array<i64: 8, 256>}, {pipeline_mode = #tpu.pipeline_mode<synchronous>, transform_indices = @transform_1, window_bounds = array<i64: 256, 128>}, {transform_indices = @transform_2, window_bounds = array<i64: 8, 128>}]} {
    %c0 = arith.constant 0 : index
    %c0_0 = arith.constant 0 : index
    %0 = vector.load %arg1[%c0, %c0_0] : memref<8x256xf32, #tpu.memory_space<vmem>>, vector<8x256xf32>
    %c0_1 = arith.constant 0 : index
    %c0_2 = arith.constant 0 : index
    %1 = vector.load %arg2[%c0_1, %c0_2] : memref<256x128xf32, #tpu.memory_space<vmem>>, vector<256x128xf32>
    %cst = arith.constant dense<0.000000e+00> : vector<8x128xf32>
    %2 = tpu.matmul %0, %1, %cst {dimension_numbers = #tpu.dot_dimension_numbers<[1], [0], [0], [1], [0, 0, 1, 1], [], []>} : vector<8x256xf32>, vector<256x128xf32>, vector<8x128xf32> -> vector<8x128xf32>
    %c0_3 = arith.constant 0 : index
    %c0_4 = arith.constant 0 : index
    %3 = vector.load %arg3[%c0_3, %c0_4] : memref<8x128xf32, #tpu.memory_space<vmem>>, vector<8x128xf32>
    tpu.vector_store %arg3[%c0_3, %c0_4], %2 {strides = array<i32>} : memref<8x128xf32, #tpu.memory_space<vmem>>, vector<8x128xf32>,
    return
  }
  func.func @transform_0(%arg0: i32) -> (i32, i32) {
    %c0_i32 = arith.constant 0 : i32
    %c0_i32_0 = arith.constant 0 : i32
    return %arg0, %c0_i32 : i32, i32
  }
  func.func @transform_1(%arg0: i32) -> (i32, i32) {
    %c0_i32 = arith.constant 0 : i32
    %c0_i32_0 = arith.constant 0 : i32
    %c0_i32_1 = arith.constant 0 : i32
    return %c0_i32, %c0_i32_0 : i32, i32
  }
  func.func @transform_2(%arg0: i32) -> (i32, i32) {
    %c0_i32 = arith.constant 0 : i32
    %c0_i32_0 = arith.constant 0 : i32
    return %arg0, %c0_i32 : i32, i32
  }
}

</mosaic_0001>

<bundles_post_ra>
// kernel: tpu_custom_call.1
= control target key start
LH: loop header
LB: loop body
LE: loop exit
PB: predicated region body
PF: predicated region fallthrough
CT: control target
= control target key end

     0   :  { %7 = vsyncpa [#allocation3], 0  ;;  %s716_s0 = inlined_call_operand.hbm [shape: f32[16,256], index: 0, kind: input, shape index: {}]   ;;  %s717_s1 = inlined_call_operand.hbm [shape: f32[256,128], index: 1, kind: input, shape index: {}]   ;;  %s718_s2 = inlined_call_operand.hbm [shape: f32[16,128], index: 2, kind: output, shape index: {}]  }
   0x1   :  { %9 = vsyncpa [#allocation3 + $0x1], 0 }
   0x2   :  { %10 = vsyncpa [#allocation6], 0 }
   0x3   :  { %11 = vsyncpa [#allocation4], 0 }
   0x4   :  { %13 = vsyncpa [#allocation4 + $0x1], 0  ;;  %s575_s9 = smov 0   ;;  %s577_s10 = smov 0  }
   0x5   :  { %s579_s11 = smov 0   ;;  %s581_s12 = smov 0  }
   0x6 LB: > { %s108_s15 = sshll.u32 %s717_s1, 4  ;;  %s599_s16 = sadd.s32 4294967295, %s555_s12   ;;  %s555_s12 = sphi %s581_s12, %s728_s12   ;;  %s551_s11 = sphi %s579_s11, %s727_s11   ;;  %s547_s10 = sphi %s577_s10, %s726_s10   ;;  %s543_s9 = sphi %s575_s9, %s725_s9   ;;  %s109_s15 = int_to_ptr.hbm [resolvable:$true] %s108_s15 }
   0x7   : > { %p351_p0 = scmp.ge.s32.totalorder %s555_s12, 1  ;;  %p40_p1 = scmp.eq.s32.totalorder %s599_s16, 0 }
   0x8   : > { %p97_p2 = scmp.lt.s32.totalorder %s555_s12, 3  ;;  %s557_s18 = smov [#allocation5]  }
   0x9   : > { %s110_s19 = sshll.u32 %s557_s18, 4  ;;  %s558_s20 = smov 128   ;;  %s111_s19 = int_to_ptr.vmem [resolvable:$true] %s110_s19 }
   0xa   : > { %p604_p3 = pnand %p351_p0, %p97_p2  ;;  %s559_s21 = smov 8  }
   0xb   : > { %s350_s22 = sadd.s32 4294967294, %s555_s12   ;;  %s615_s23 = sadd.s32 1, %s555_s12  }
   0xc   : > { %p374_p4 = pneg %p604_p3  ;;  %s26_s24 = sadd.s32 1, %s551_s11 }
   0xd   : > { %s23_s25 = ssub.s32 %s555_s12, %s615_s23  ;;  %p33_p7 = scmp.ne.s32.totalorder %s551_s11, %s547_s10 }
   0xe   : > { %p375_p6 = pnand %p374_p4, %p40_p1  ;;  %p24_p8 = scmp.eq.s32.totalorder %s23_s25, 0 }
   0xf   : > { %p34_p9 = scmp.eq.s32.totalorder %s555_s12, 0  ;;  %p39_p10 = scmp.ne.s32.totalorder %s547_s10, %s543_s9 }
  0x10   : > { %377 = dma.hbm_to_vmem [thread:$0]  (!%p375_p6), %s109_s15, 4096, %s111_s19, [#allocation6], %s558_s20, %s558_s20, %s559_s21  }
  0x11   : > { %p84_p11 = scmp.eq.s32.totalorder %s599_s16, 1  ;;  %p631_p12 = por %p40_p1, %p39_p10 }
  0x12   : > { %s627_s26 = scalar_select %p24_p8, %s551_s11, %s26_s24  }
  0x13   : > { %p635_p13 = por %p84_p11, %p33_p7  ;;  %p90_p0 = scmp.eq.s32.totalorder %s350_s22, 1 }
  0x14   : > { %p35_p2 = por %p34_p9, %p33_p7  ;;  %s124_s29 = sand.u32 1, %s551_s11  }
  0x15   : > { %p640_p4 = por %p90_p0, %p39_p10  ;;  %p387_p6 = scmp.lt.s32.totalorder %s555_s12, 2 }
  0x16   : > { %s354_s3 = sshll.u32 %s124_s29, 4  ;;  %s365_s4 = sshll.u32 %s555_s12, 4 }
  0x17   : > { %s133_s7 = scalar_lea.hbm %s716_s0, %s365_s4  ;;  %s128_s13 = scalar_lea.vmem [#allocation2], %s354_s3 }
  0x18   : > { %s135_s8 = sshll.u32 %s133_s7, 4  ;;  %s137_s14 = sshll.u32 %s128_s13, 4  ;;  %s136_s8 = int_to_ptr.hbm [resolvable:$true] %s135_s8  ;;  %s138_s14 = int_to_ptr.vmem [resolvable:$true] %s137_s14 }
  0x19   : > { %p649_p8 = pnand %p387_p6, %p35_p2  ;;  %s125_s18 = scalar_lea.sflag [#allocation3], %s124_s29 }
  0x1a   : > { %s455_s19 = sshra.s32 %s136_s8, 4  ;;  %s462_s24 = scalar_lea.hbm %s716_s0, 32  ;;  %s456_s19 = int_to_ptr.hbm [resolvable:$true] %s455_s19 }
  0x1b   : > { %s457_s20 = scalar_lea.hbm %s456_s19, 16  ;;  %p459_p9 = pneg %p649_p8 }
  0x1c   : > { %p458_p7 = scmp.ne.s32.totalorder %s456_s19, %s457_s20  ;;  %p463_p0 = scmp.lt.s32.totalorder %s456_s19, %s716_s0 }
  0x1d   : > { %p464_p2 = scmp.lt.s32.totalorder %s462_s24, %s457_s20 }
  0x1e   : > { %p460_p10 = pnand %p459_p9, %p458_p7 }
  0x1f   : > { %p465_p6 = por %p464_p2, %p463_p0 }
  0x20   : > { %p461_p11 = pneg %p460_p10 }
  0x22   : > { %p466_p5 = pnand %p465_p6, %p461_p11 }
  0x24   : > { %469 = shalt.err (!%p466_p5)
}
  0x25   : > { %381 = dma.hbm_to_vmem [thread:$0]  (!%p649_p8), %s136_s8, 256, %s138_s14, %s125_s18  }
  0x26   : > { %146 = sbr.rel (%p604_p3) target bundleno = 210 (0xd2), region = 28  ;;  %s666_s29 = sand.u32 (!%p604_p3), 1, %s547_s10  }
  0x27   : > { %s358_s4 = sshll.u32 (!%p604_p3), %s666_s29, 4  ;;  %s149_s5 = scalar_lea.sflag (!%p604_p3), [#allocation3], %s666_s29 }
  0x28   : > { %s670_s6 = scalar_lea.vmem (!%p604_p3), [#allocation2], %s358_s4 }
  0x2b   : > { %530 = dma.done.wait (%p631_p12), %s149_s5, 256  }
  0x2c   : > { %532 = vsyncadd (%p631_p12), %s149_s5, 4294967040 }
  0x2d   : > { %534 = dma.done.wait (%p40_p1), [#allocation6], 4096  }
  0x2e   : > { %536 = vsyncadd (%p40_p1), [#allocation6], 4294963200  ;;  %v196_v0 = vld [vmem:[#allocation5 + $0x78] sm:$0xff]  ;;  %v195_v2 = vld [vmem:[#allocation5 + $0x70] sm:$0xff]  ;;  %s360_s17 = sshll.u32 %s666_s29, 3  ;;  %s362_s27 = sshll.u32 %s599_s16, 3 }
  0x2f   : > { %v212_v1 = vld [vmem:[#allocation5 + $0xf8] sm:$0xff]  ;;  %213 = vmatpush.msra.mxu0 %v196_v0  ;;  %v211_v3 = vld [vmem:[#allocation5 + $0xf0] sm:$0xff]  ;;  %v194_v4 = vld [vmem:[#allocation5 + $0x68] sm:$0xff]  ;;  %s265_s13 = scalar_lea.hbm %s718_s2, %s362_s27  ;;  %s178_s14 = scalar_lea.vmem [#allocation7], %s360_s17 }
  0x30   : > { %233 = vmatpush.msra.mxu1 %v212_v1  ;;  %v210_v5 = vld [vmem:[#allocation5 + $0xe8] sm:$0xff]  ;;  %v193_v6 = vld [vmem:[#allocation5 + $0x60] sm:$0xff]  ;;  %v192_v8 = vld [vmem:[#allocation5 + $0x58] sm:$0xff]  ;;  %s267_s15 = sshll.u32 %s178_s14, 4  ;;  %s269_s18 = sshll.u32 %s265_s13, 4  ;;  %s268_s15 = int_to_ptr.vmem [resolvable:$true] %s267_s15  ;;  %s270_s18 = int_to_ptr.hbm [resolvable:$true] %s269_s18 }
  0x31   : > { %214 = vmatpush.msra.mxu0 %v195_v2  ;;  %v209_v7 = vld [vmem:[#allocation5 + $0xe0] sm:$0xff]  ;;  %v208_v9 = vld [vmem:[#allocation5 + $0xd8] sm:$0xff]  ;;  %v191_v10 = vld [vmem:[#allocation5 + $0x50] sm:$0xff]  ;;  %s255_s19 = scalar_lea.sflag [#allocation4], %s666_s29  ;;  %s499_s20 = sshra.s32 %s270_s18, 4  ;;  %s500_s20 = int_to_ptr.hbm [resolvable:$true] %s499_s20 }
  0x32   : > { %234 = vmatpush.msra.mxu1 %v211_v3  ;;  %v207_v11 = vld [vmem:[#allocation5 + $0xd0] sm:$0xff]  ;;  %v190_v12 = vld [vmem:[#allocation5 + $0x48] sm:$0xff]  ;;  %v189_v14 = vld [vmem:[#allocation5 + $0x40] sm:$0xff]  ;;  %s501_s21 = scalar_lea.hbm %s500_s20, 8  ;;  %s505_s24 = scalar_lea.hbm %s718_s2, 16 }
  0x33   : > { %215 = vmatpush.msra.mxu0 %v194_v4  ;;  %v206_v13 = vld [vmem:[#allocation5 + $0xc8] sm:$0xff]  ;;  %v205_v15 = vld [vmem:[#allocation5 + $0xc0] sm:$0xff]  ;;  %v188_v16 = vld [vmem:[#allocation5 + $0x38] sm:$0xff]  ;;  %p502_p1 = scmp.ne.s32.totalorder %s500_s20, %s501_s21  ;;  %p506_p12 = scmp.lt.s32.totalorder %s500_s20, %s718_s2 }
  0x34   : > { %235 = vmatpush.msra.mxu1 %v210_v5  ;;  %v204_v17 = vld [vmem:[#allocation5 + $0xb8] sm:$0xff]  ;;  %v187_v18 = vld [vmem:[#allocation5 + $0x30] sm:$0xff]  ;;  %v186_v20 = vld [vmem:[#allocation5 + $0x28] sm:$0xff]  ;;  %p507_p8 = scmp.lt.s32.totalorder %s505_s24, %s501_s21 }
  0x35   : > { %216 = vmatpush.msra.mxu0 %v193_v6  ;;  %v203_v19 = vld [vmem:[#allocation5 + $0xb0] sm:$0xff]  ;;  %v202_v21 = vld [vmem:[#allocation5 + $0xa8] sm:$0xff]  ;;  %v185_v22 = vld [vmem:[#allocation5 + $0x20] sm:$0xff]  ;;  %p503_p3 = pnand %p502_p1, %p635_p13 }
  0x36   : > { %236 = vmatpush.msra.mxu1 %v209_v7  ;;  %v201_v23 = vld [vmem:[#allocation5 + $0xa0] sm:$0xff]  ;;  %v184_v24 = vld [vmem:[#allocation5 + $0x18] sm:$0xff]  ;;  %v183_v26 = vld [vmem:[#allocation5 + $0x10] sm:$0xff]  ;;  %p508_p7 = por %p507_p8, %p506_p12 }
  0x37   : > { %217 = vmatpush.msra.mxu0 %v192_v8  ;;  %v200_v25 = vld [vmem:[#allocation5 + $0x98] sm:$0xff]  ;;  %v199_v27 = vld [vmem:[#allocation5 + $0x90] sm:$0xff]  ;;  %v182_v28 = vld [vmem:[#allocation5 + $0x8] sm:$0xff]  ;;  %p504_p5 = pneg %p503_p3 }
  0x38   : > { %237 = vmatpush.msra.mxu1 %v208_v9  ;;  %v198_v29 = vld [vmem:[#allocation5 + $0x88] sm:$0xff]  ;;  %v181_v30 = vld [vmem:[#allocation5] sm:$0xff] }
  0x39   : > { %218 = vmatpush.msra.mxu0 %v191_v10  ;;  %v197_v31 = vld [vmem:[#allocation5 + $0x80] sm:$0xff]  ;;  %v180_v33 = vld [vmem:[%s670_s6 + $0x8] sm:$0xff]  ;;  %p509_p9 = pnand %p508_p7, %p504_p5 }
  0x3a   : > { %238 = vmatpush.msra.mxu1 %v207_v11  ;;  %v179_v32 = vld [vmem:[%s670_s6] sm:$0xff] }
  0x3b   : > { %219 = vmatpush.msra.mxu0 %v190_v12 }
  0x3c   : > { %239 = vmatpush.msra.mxu1 %v206_v13 }
  0x3d   : > { %220 = vmatpush.msra.mxu0 %v189_v14 }
  0x3e   : > { %240 = vmatpush.msra.mxu1 %v205_v15 }
  0x3f   : > { %221 = vmatpush.msra.mxu0 %v188_v16 }
  0x40   : > { %241 = vmatpush.msra.mxu1 %v204_v17 }
  0x41   : > { %222 = vmatpush.msra.mxu0 %v187_v18 }
  0x42   : > { %242 = vmatpush.msra.mxu1 %v203_v19 }
  0x43   : > { %223 = vmatpush.msra.mxu0 %v186_v20 }
  0x44   : > { %243 = vmatpush.msra.mxu1 %v202_v21 }
  0x45   : > { %224 = vmatpush.msra.mxu0 %v185_v22 }
  0x46   : > { %244 = vmatpush.msra.mxu1 %v201_v23 }
  0x47   : > { %225 = vmatpush.msra.mxu0 %v184_v24 }
  0x48   : > { %245 = vmatpush.msra.mxu1 %v200_v25 }
  0x49   : > { %226 = vmatpush.msra.mxu0 %v183_v26 }
  0x4a   : > { %246 = vmatpush.msra.mxu1 %v199_v27 }
  0x4b   : > { %227 = vmatpush.msra.mxu0 %v182_v28 }
  0x4c   : > { %247 = vmatpush.msra.mxu1 %v198_v29 }
  0x4d   : > { %228 = vmatpush.msra.mxu0 %v181_v30 }
  0x4e   : > { %248 = vmatpush.msra.mxu1 %v197_v31  ;;  %229 = vmatmul.f32.vlgmr.msra.gmra.mxu0 %v179_v32 }
  0x4f   : > { %249 = vmatmul.f32.vlgmr.msra.gmra.mxu1 %v180_v33 }
  0xcb   : > { %v230_v34 = vpop.f32.mrf.mxu0 }
  0xcc   : > { %v250_v35 = vpop.f32.mrf.mxu1 }
  0xcd   : > { %v251_v36 = vadd.f32 %v250_v35, %v230_v34 }
  0xcf   : > { %253 = vst [vmem:[%s178_s14] sm:$0xff] %v251_v36 }
  0xd0   : > { %512 = shalt.err (!%p509_p9)
}
  0xd1   : > { %372 = dma.vmem_to_hbm [thread:$0]  (%p635_p13), %s268_s15, 128, %s270_s18, %s255_s19  }
  0xd2 PF: > { %s281_s29 = sand.u32 1, %s543_s9   ;;  %p724_p10 = scmp.ge.s32.totalorder %s555_s12, 2 }
  0xd3   : > { %s282_s4 = scalar_lea.sflag [#allocation4], %s281_s29 }
  0xd4   : > { %p383_p11 = pnand %p724_p10, %p640_p4 }
  0xd6   : > { %p384_p0 = pneg %p383_p11 }
  0xd8   : > { %538 = dma.done.wait (%p384_p0), %s282_s4, 128  }
  0xd9   : > { %540 = vsyncadd (%p384_p0), %s282_s4, 4294967168  ;;  %p16_p2 = scmp.ge.s32.totalorder %s615_s23, 4   ;;  %s725_s9 = smov %s547_s10 }
  0xda   : > { %s726_s10 = smov %s551_s11  ;;  %s727_s11 = smov %s627_s26 }
  0xdb   : > { %s728_s12 = smov %s615_s23  ;;  %18 = sbr.rel (!%p16_p2) target bundleno = 6 (0x6), region = 77 }
  0xe0   :  { %288 = vsyncpa [#allocation3], 1 }
  0xe1   :  { %290 = vsyncpa [#allocation3 + $0x1], 1 }
  0xe2   :  { %291 = vsyncpa [#allocation6], 1 }
  0xe3   :  { %292 = vsyncpa [#allocation4], 1 }
  0xe4   :  { %294 = vsyncpa [#allocation4 + $0x1], 1 }

</bundles_post_ra>
